<compile_context>
chip_gen: v7x
topology: tpu7x:2x2x1
jax: 0.10.0
libtpu: 0.0.40
codegen_flags: <defaults>
</compile_context>

<pallas_src>
import jax
import jax.numpy as jnp
from jax.experimental import pallas as pl
from jax.experimental.pallas import tpu as pltpu


def _fused_head_kernel(x_ref, w_ref, b_ref, o_ref):
    # x_ref: (Cin, t_hw)   activation tile, spatial on the lane axis
    # w_ref: (Cout, Cin)   fused [bbox; cls; ldm] 1x1-conv weight
    # b_ref: (Cout, 1)     fused bias
    # o_ref: (Cout, t_hw)  lane-dense output tile
    acc = jnp.dot(w_ref[...], x_ref[...], preferred_element_type=jnp.float32)
    o_ref[...] = (acc + b_ref[...]).astype(o_ref.dtype)


def fused_heads_1x1(x_nchw, w_fused, b_fused, *, t_hw_target=2048):
    """Fused 1x1-conv detection heads, channels-first.

    x_nchw:  (N, Cin, H, W)
    w_fused: (Cout, Cin)  -- concatenated bbox/cls/ldm 1x1 weights (squeezed)
    b_fused: (Cout,)
    Returns (N, Cout, H*W)  (channels-first, spatial on the last/lane axis).
    """
    N, Cin, H, W = x_nchw.shape
    Cout = w_fused.shape[0]
    HW = H * W

    x = x_nchw.reshape(N, Cin, HW)     # free reshape of NCHW -- no transpose
    b2 = b_fused.reshape(Cout, 1)

    # Spatial tile on the lane axis: either the full spatial extent (always a
    # legal block) or a large multiple of 128.  Ragged last blocks are masked
    # by Pallas, so no explicit padding / output slicing is needed.
    if HW <= t_hw_target:
        t_hw = HW
    else:
        t_hw = max(128, (t_hw_target // 128) * 128)
    grid = (N, pl.cdiv(HW, t_hw))

    itemsize = jnp.dtype(x_nchw.dtype).itemsize
    cost = pl.CostEstimate(
        flops=2 * N * HW * Cin * Cout,
        transcendentals=0,
        bytes_accessed=(x.size + w_fused.size + b_fused.size + N * Cout * HW)
        * itemsize,
    )

    return pl.pallas_call(
        _fused_head_kernel,
        out_shape=jax.ShapeDtypeStruct((N, Cout, HW), x_nchw.dtype),
        grid_spec=pltpu.PrefetchScalarGridSpec(
            num_scalar_prefetch=0,
            grid=grid,
            in_specs=[
                pl.BlockSpec((None, Cin, t_hw), lambda n, j: (n, 0, j)),
                pl.BlockSpec((Cout, Cin), lambda n, j: (0, 0)),
                pl.BlockSpec((Cout, 1), lambda n, j: (0, 0)),
            ],
            out_specs=pl.BlockSpec((None, Cout, t_hw), lambda n, j: (n, 0, j)),
        ),
        compiler_params=pltpu.CompilerParams(
            dimension_semantics=("parallel", "parallel"),
        ),
        cost_estimate=cost,
    )(x, w_fused, b2)


def retinaface_head_forward(features, head_params, num_anchors):
    """Detection-head portion of RetinaFaceNet.forward.

    features:    list of SSH outputs, each (N, Cin, H_i, W_i), NCHW.
    head_params: list (per level) of dicts with squeezed 1x1-conv params:
                 'bbox_w' (4A, Cin), 'bbox_b' (4A,),
                 'cls_w'  (2A, Cin), 'cls_b'  (2A,),
                 'ldm_w' (10A, Cin), 'ldm_b' (10A,).
    Returns (bbox (N, sum_i HW_i*A, 4), softmax(cls) (N, ..., 2),
             ldm (N, ..., 10)) matching the PyTorch forward.
    """
    A = num_anchors
    bbox_list, cls_list, ldm_list = [], [], []
    for x, p in zip(features, head_params):
        N, Cin, H, W = x.shape
        HW = H * W
        w_fused = jnp.concatenate([p["bbox_w"], p["cls_w"], p["ldm_w"]], axis=0)
        b_fused = jnp.concatenate([p["bbox_b"], p["cls_b"], p["ldm_b"]], axis=0)
        assert w_fused.shape == (16 * A, Cin)

        out = fused_heads_1x1(x, w_fused, b_fused)        # (N, 16A, HW)
        # Cheap permute on the small output (16A channels); equivalent to the
        # PyTorch permute(0,2,3,1) of each head output.
        out = jnp.transpose(out, (0, 2, 1))               # (N, HW, 16A)
        bbox = out[..., : 4 * A].reshape(N, HW * A, 4)
        cls = out[..., 4 * A : 6 * A].reshape(N, HW * A, 2)
        ldm = out[..., 6 * A :].reshape(N, HW * A, 10)
        bbox_list.append(bbox)
        cls_list.append(cls)
        ldm_list.append(ldm)

    bbox = jnp.concatenate(bbox_list, axis=1)
    cls = jnp.concatenate(cls_list, axis=1)
    ldm = jnp.concatenate(ldm_list, axis=1)
    return bbox, jax.nn.softmax(cls, axis=-1), ldm


if __name__ == "__main__":
    key = jax.random.PRNGKey(0)
    N = 2
    Cin = 64                                   # cfg['out_channel'] (mobilenet0.25)
    A = 2                                      # anchor_num in _make_*_head
    level_shapes = [(16, 16), (8, 8), (4, 4)]  # small SSH feature-map sizes

    features = []
    head_params = []
    for (H, W) in level_shapes:
        key, kx, k1, k2, k3, k4, k5, k6 = jax.random.split(key, 8)
        features.append(jax.random.normal(kx, (N, Cin, H, W), dtype=jnp.float32))
        head_params.append(dict(
            bbox_w=jax.random.normal(k1, (4 * A, Cin), jnp.float32) * 0.05,
            bbox_b=jax.random.normal(k2, (4 * A,), jnp.float32) * 0.05,
            cls_w=jax.random.normal(k3, (2 * A, Cin), jnp.float32) * 0.05,
            cls_b=jax.random.normal(k4, (2 * A,), jnp.float32) * 0.05,
            ldm_w=jax.random.normal(k5, (10 * A, Cin), jnp.float32) * 0.05,
            ldm_b=jax.random.normal(k6, (10 * A,), jnp.float32) * 0.05,
        ))

    bbox, cls, ldm = jax.block_until_ready(
        retinaface_head_forward(features, head_params, A))

    # --- reference: plain-JAX equivalent of the PyTorch head forward ---
    def ref_head(x, w, b, k):
        n = x.shape[0]
        o = jnp.einsum("nchw,oc->nhwo", x, w) + b    # NHWC 1x1-conv output
        return o.reshape(n, -1, k)

    rb = jnp.concatenate(
        [ref_head(x, p["bbox_w"], p["bbox_b"], 4)
         for x, p in zip(features, head_params)], axis=1)
    rc = jnp.concatenate(
        [ref_head(x, p["cls_w"], p["cls_b"], 2)
         for x, p in zip(features, head_params)], axis=1)
    rl = jnp.concatenate(
        [ref_head(x, p["ldm_w"], p["ldm_b"], 10)
         for x, p in zip(features, head_params)], axis=1)
    rc = jax.nn.softmax(rc, axis=-1)

    tot = sum(h * w for h, w in level_shapes) * A
    assert bbox.shape == (N, tot, 4)
    assert cls.shape == (N, tot, 2)
    assert ldm.shape == (N, tot, 10)
    assert jnp.allclose(bbox, rb, atol=1e-4, rtol=1e-4)
    assert jnp.allclose(cls, rc, atol=1e-4, rtol=1e-4)
    assert jnp.allclose(ldm, rl, atol=1e-4, rtol=1e-4)

    print("KERNEL_OK")
</pallas_src>

<mosaic_0001>
module attributes {stable_mosaic.version = 11 : i64} {
  func.func @_fused_head_kernel(%arg0: i32, %arg1: i32, %arg2: memref<1x64x256xf32, #tpu.memory_space<vmem>>, %arg3: memref<32x64xf32, #tpu.memory_space<vmem>>, %arg4: memref<32x1xf32, #tpu.memory_space<vmem>>, %arg5: memref<1x32x256xf32, #tpu.memory_space<vmem>>) attributes {dimension_semantics = [#tpu.dimension_semantics<parallel>, #tpu.dimension_semantics<parallel>], iteration_bounds = array<i64: 2, 1>, scalar_prefetch = 0 : i64, scratch_operands = 0 : i64, tpu.core_type = #tpu.core_type<tc>, window_params = [{transform_indices = @transform_0, window_bounds = array<i64: 1, 64, 256>}, {pipeline_mode = #tpu.pipeline_mode<synchronous>, transform_indices = @transform_1, window_bounds = array<i64: 32, 64>}, {pipeline_mode = #tpu.pipeline_mode<synchronous>, transform_indices = @transform_2, window_bounds = array<i64: 32, 1>}, {transform_indices = @transform_3, window_bounds = array<i64: 1, 32, 256>}]} {
    %c0 = arith.constant 0 : index
    %c0_0 = arith.constant 0 : index
    %0 = vector.load %arg3[%c0, %c0_0] : memref<32x64xf32, #tpu.memory_space<vmem>>, vector<32x64xf32>
    %c0_1 = arith.constant 0 : index
    %c0_2 = arith.constant 0 : index
    %c0_3 = arith.constant 0 : index
    %1 = vector.load %arg2[%c0_1, %c0_2, %c0_3] : memref<1x64x256xf32, #tpu.memory_space<vmem>>, vector<1x64x256xf32>
    %2 = vector.shape_cast %1 : vector<1x64x256xf32> to vector<64x256xf32>
    %cst = arith.constant dense<0.000000e+00> : vector<32x256xf32>
    %3 = tpu.matmul %0, %2, %cst {dimension_numbers = #tpu.dot_dimension_numbers<[1], [0], [0], [1], [0, 0, 1, 1], [], []>} : vector<32x64xf32>, vector<64x256xf32>, vector<32x256xf32> -> vector<32x256xf32>
    %c0_4 = arith.constant 0 : index
    %c0_5 = arith.constant 0 : index
    %4 = vector.load %arg4[%c0_4, %c0_5] : memref<32x1xf32, #tpu.memory_space<vmem>>, vector<32x1xf32>
    %5 = vector.broadcast %4 : vector<32x1xf32> to vector<32x256xf32>
    %6 = arith.addf %3, %5 : vector<32x256xf32>
    %c0_6 = arith.constant 0 : index
    %c0_7 = arith.constant 0 : index
    %c0_8 = arith.constant 0 : index
    %7 = vector.load %arg5[%c0_6, %c0_7, %c0_8] : memref<1x32x256xf32, #tpu.memory_space<vmem>>, vector<1x32x256xf32>
    %8 = vector.shape_cast %7 : vector<1x32x256xf32> to vector<32x256xf32>
    %9 = vector.shape_cast %6 : vector<32x256xf32> to vector<1x32x256xf32>
    tpu.vector_store %arg5[%c0_6, %c0_7, %c0_8], %9 {strides = array<i32>} : memref<1x32x256xf32, #tpu.memory_space<vmem>>, vector<1x32x256xf32>,
    return
  }
  func.func @transform_0(%arg0: i32, %arg1: i32) -> (i32, i32, i32) {
    %c0_i32 = arith.constant 0 : i32
    %c0_i32_0 = arith.constant 0 : i32
    return %arg0, %c0_i32, %arg1 : i32, i32, i32
  }
  func.func @transform_1(%arg0: i32, %arg1: i32) -> (i32, i32) {
    %c0_i32 = arith.constant 0 : i32
    %c0_i32_0 = arith.constant 0 : i32
    %c0_i32_1 = arith.constant 0 : i32
    return %c0_i32, %c0_i32_0 : i32, i32
  }
  func.func @transform_2(%arg0: i32, %arg1: i32) -> (i32, i32) {
    %c0_i32 = arith.constant 0 : i32
    %c0_i32_0 = arith.constant 0 : i32
    %c0_i32_1 = arith.constant 0 : i32
    return %c0_i32, %c0_i32_0 : i32, i32
  }
  func.func @transform_3(%arg0: i32, %arg1: i32) -> (i32, i32, i32) {
    %c0_i32 = arith.constant 0 : i32
    %c0_i32_0 = arith.constant 0 : i32
    return %arg0, %c0_i32, %arg1 : i32, i32, i32
  }
}

</mosaic_0001>

<bundles_post_ra>
// kernel: tpu_custom_call.1
= control target key start
LH: loop header
LB: loop body
LE: loop exit
PB: predicated region body
PF: predicated region fallthrough
CT: control target
= control target key end

     0   :  { %8 = vsyncpa [#allocation3], 0  ;;  %s941_s0 = inlined_call_operand.hbm [shape: f32[2,64,256], index: 0, kind: input, shape index: {}]   ;;  %s942_s1 = inlined_call_operand.vmem [shape: f32[32,64], index: 1, kind: input, shape index: {}]   ;;  %s943_s2 = inlined_call_operand.vmem [shape: f32[32,1], index: 2, kind: input, shape index: {}]   ;;  %s944_s3 = inlined_call_operand.hbm [shape: f32[2,32,256], index: 3, kind: output, shape index: {}]  }
   0x1   :  { %10 = vsyncpa [#allocation3 + $0x1], 0 }
   0x2   :  { %11 = vsyncpa [#allocation4], 0 }
   0x3   :  { %13 = vsyncpa [#allocation4 + $0x1], 0  ;;  %s723_s12 = smov 0   ;;  %s725_s13 = smov 0  }
   0x4   :  { %s727_s14 = smov 0   ;;  %s729_s15 = smov 0  }
   0x5   :  { %s731_s16 = smov 0   ;;  %s733_s17 = smov 0  }
   0x6 LB: > { %s466_s18 = sadd.s32 4294967295, %s693_s17   ;;  %s467_s19 = sadd.s32 4294967294, %s693_s17   ;;  %s693_s17 = sphi %s733_s17, %s19_s17   ;;  %s689_s16 = sphi %s731_s16, %s959_s16   ;;  %s685_s15 = sphi %s729_s15, %s958_s15   ;;  %s681_s14 = sphi %s727_s14, %s957_s14   ;;  %s677_s13 = sphi %s725_s13, %s956_s13   ;;  %s673_s12 = sphi %s723_s12, %s955_s12  }
   0x7   : > { %s31_s20 = sadd.s32 1, %s689_s16  ;;  %s40_s21 = sadd.s32 1, %s681_s14 }
   0x8   : > { %p33_p0 = scmp.ge.s32.totalorder %s31_s20, 2  ;;  %p47_p1 = scmp.ne.s32.totalorder %s681_s14, %s677_s13 }
   0x9   : > { %p48_p2 = scmp.eq.s32.totalorder %s693_s17, 0  ;;  %p53_p3 = scmp.ne.s32.totalorder %s677_s13, %s673_s12 }
   0xa   : > { %s961_s20 = smov (%p33_p0, %s31_s20), 0  ;;  %p54_p5 = scmp.eq.s32.totalorder %s466_s18, 0 }
   0xb   : > { %p764_p4 = por %p48_p2, %p47_p1  ;;  %s35_s23 = ssub.s32 %s689_s16, %s961_s20 }
   0xc   : > { %p121_p6 = scmp.eq.s32.totalorder %s466_s18, 1  ;;  %p38_p7 = scmp.eq.s32.totalorder %s35_s23, 0 }
   0xd   : > { %p770_p8 = por %p54_p5, %p53_p3  ;;  %p127_p10 = scmp.eq.s32.totalorder %s467_s19, 1 }
   0xe   : > { %p774_p9 = por %p121_p6, %p47_p1  ;;  %p523_p13 = scmp.lt.s32.totalorder %s693_s17, 2 }
   0xf   : > { %s779_s26 = scalar_select %p38_p7, %s681_s14, %s40_s21  }
  0x10   : > { %s948_s25 = scalar_select %p774_p9, 1, 0 }
  0x11   : > { %p781_p11 = por %p127_p10, %p53_p3  ;;  %s153_s28 = sand.u32 1, %s681_s14  }
  0x12   : > { %s470_s29 = sshll.u32 %s153_s28, 7  ;;  %s485_s30 = sshll.u32 %s689_s16, 11 }
  0x13   : > { %s949_s27 = scalar_select %p781_p11, 1, 0 }
  0x14   : > { %s792_s6 = scalar_lea.hbm %s941_s0, %s485_s30  ;;  %s157_s7 = scalar_lea.vmem [#allocation2], %s470_s29 }
  0x15   : > { %s166_s8 = sshll.u32 %s157_s7, 4  ;;  %p798_p0 = pnand %p523_p13, %p764_p4  ;;  %s794_s8 = int_to_ptr.vmem [resolvable:$true] %s166_s8 }
  0x16   : > { %s803_s10 = scalar_lea.sflag [#allocation3], %s153_s28  ;;  %s581_s11 = scalar_lea.hbm %s792_s6, 2048 }
  0x17   : > { %p582_p2 = scmp.ne.s32.totalorder %s792_s6, %s581_s11  ;;  %p583_p3 = pneg %p798_p0 }
  0x18   : > { %s586_s21 = scalar_lea.hbm %s941_s0, 4096  ;;  %p587_p4 = scmp.lt.u32.totalorder %s792_s6, %s941_s0 }
  0x19   : > { %p584_p5 = pnand %p583_p3, %p582_p2  ;;  %p588_p7 = scmp.lt.u32.totalorder %s586_s21, %s581_s11 }
  0x1a   : > { %p590_p13 = scmp.lt.u32.totalorder %s581_s11, %s792_s6 }
  0x1b   : > { %p585_p6 = pneg %p584_p5  ;;  %p589_p10 = por %p588_p7, %p587_p4 }
  0x1d   : > { %p591_p12 = por %p590_p13, %p589_p10 }
  0x1f   : > { %p592_p1 = pnand %p591_p12, %p585_p6 }
  0x21   : > { %595 = shalt.err (!%p592_p1)
}
  0x22   : > { %s596_s28 = scalar_lea.vmem %s794_s8, 2048  ;;  %s695_s29 = smov [#allocation2]  }
  0x23   : > { %p597_p2 = scmp.ne.s32.totalorder %s794_s8, %s596_s28  ;;  %s601_s30 = sshll.u32 %s695_s29, 4  ;;  %s602_s30 = int_to_ptr.vmem [resolvable:$false] %s601_s30 }
  0x24   : > { %s603_s4 = scalar_lea.vmem %s602_s30, 4096  ;;  %p604_p9 = scmp.lt.s32.totalorder %s794_s8, %s602_s30 }
  0x25   : > { %p599_p5 = pnand %p597_p2, %p583_p3  ;;  %p605_p4 = scmp.lt.s32.totalorder %s603_s4, %s596_s28 }
  0x27   : > { %p600_p11 = pneg %p599_p5  ;;  %p606_p7 = por %p605_p4, %p604_p9 }
  0x29   : > { %p607_p10 = pnand %p606_p7, %p600_p11 }
  0x2b   : > { %610 = shalt.err (!%p607_p10)
}
  0x2c   : > { %s696_s5 = smov 256   ;;  %s697_s7 = smov 16  }
  0x2d   : > { %518 = dma.hbm_to_vmem [thread:$0]  (!%p798_p0), %s792_s6, 2048, %s794_s8, %s803_s10, %s696_s5, %s696_s5, %s697_s7  }
  0x2e   : > { %p174_p12 = scmp.lt.s32.totalorder %s693_s17, 3  ;;  %p951_p1 = scmp.ge.s32.totalorder %s693_s17, 1 }
  0x30   : > { %p175_p3 = pnand %p951_p1, %p174_p12 }
  0x31   : > { %s835_s11 = sand.u32 (!%p175_p3), 1, %s677_s13  }
  0x32   : > { %178 = sbr.rel (%p175_p3) target bundleno = 311 (0x137), region = 32  ;;  %s474_s18 = sshll.u32 (!%p175_p3), %s835_s11, 7 }
  0x33   : > { %s181_s19 = scalar_lea.sflag (!%p175_p3), [#allocation3], %s835_s11  ;;  %s839_s21 = scalar_lea.vmem (!%p175_p3), [#allocation2], %s474_s18 }
  0x39   : > { %664 = dma.done.wait (%p770_p8), %s181_s19, 2048  }
  0x3a   : > { %666 = vsyncadd (%p770_p8), %s181_s19, 4294965248  ;;  %v698_v0 = vmov 0.0   ;;  %v699_v1 = vmov 0   ;;  %v214_v2 = vld [vmem:[%s839_s21 + $0x8] sm:$0xff]  ;;  %v216_v3 = vld [vmem:[%s839_s21 + $0x18] sm:$0xff]  ;;  %vm253_vm0 = vcmask 523264  }
  0x3b   : > { %330 = vmatprep.mubr.f32.mxu0 %v698_v0  ;;  %342 = vmatprep.mubr.f32.mxu1 %v698_v0  ;;  %v213_v4 = vld [vmem:[%s839_s21] sm:$0xff]  ;;  %v487_v5 = vpack.c.bf16 %v216_v3, %v214_v2  ;;  %v215_v6 = vld [vmem:[%s839_s21 + $0x10] sm:$0xff]  ;;  %v218_v7 = vld [vmem:[%s839_s21 + $0x28] sm:$0xff]  ;;  %s475_s24 = sshll.u32 %s835_s11, 6  ;;  %s486_s9 = sshll.u32 %s685_s15, 10 }
  0x3c   : > { %580 = vset.pattern.permute.xlu1 %v699_v1  ;;  %579 = vset.pattern.permute.xlu0 %v699_v1  ;;  %v220_v8 = vld [vmem:[%s839_s21 + $0x38] sm:$0xff]  ;;  %v489_v9 = vpack.c.bf16 %v215_v6, %v213_v4  ;;  %v217_v11 = vld [vmem:[%s839_s21 + $0x20] sm:$0xff]  ;;  %v219_v12 = vld [vmem:[%s839_s21 + $0x30] sm:$0xff]  ;;  %s206_s6 = scalar_lea.vmem [#allocation5], %s475_s24  ;;  %s892_s22 = scalar_lea.hbm %s944_s3, %s486_s9 }
  0x3d   : > { %v491_v10 = vpack.c.bf16 %v220_v8, %v218_v7  ;;  %v222_v13 = vld [vmem:[%s839_s21 + $0x48] sm:$0xff]  ;;  %488 = vmatprep.subr.bf16.mxu0 %v487_v5  ;;  %503 = vmatprep.subr.bf16.mxu1 %v487_v5  ;;  %v224_v14 = vld [vmem:[%s839_s21 + $0x58] sm:$0xff]  ;;  %v493_v15 = vpack.c.bf16 %v219_v12, %v217_v11  ;;  %v221_v17 = vld [vmem:[%s839_s21 + $0x40] sm:$0xff]  ;;  %s379_s8 = sshll.u32 %s206_s6, 4  ;;  %s364_s23 = scalar_lea.sflag [#allocation4], %s835_s11  ;;  %s887_s8 = int_to_ptr.vmem [resolvable:$true] %s379_s8 }
  0x3e   : > { %490 = vmatpush1.bf16.msra.mxu0 %v489_v9  ;;  %507 = vmatpush1.bf16.msra.mxu1 %v489_v9  ;;  %v495_v16 = vpack.c.bf16 %v224_v14, %v222_v13  ;;  %v223_v18 = vld [vmem:[%s839_s21 + $0x50] sm:$0xff]  ;;  %v226_v19 = vld [vmem:[%s839_s21 + $0x68] sm:$0xff]  ;;  %v228_v20 = vld [vmem:[%s839_s21 + $0x78] sm:$0xff]  ;;  %s611_s28 = scalar_lea.vmem %s887_s8, 1024  ;;  %p952_p9 = scmp.ne.s32.totalorder %s948_s25, 0 }
  0x3f   : > { %492 = vmatprep.subr.bf16.mxu0 %v491_v10  ;;  %504 = vmatprep.subr.bf16.mxu1 %v491_v10  ;;  %v231_v21 = vld [vmem:[%s943_s2 + $0x10] sm:$0xff]  ;;  %v229_v22 = vld [vmem:[%s943_s2] sm:$0xff]  ;;  %v497_v23 = vpack.c.bf16 %v223_v18, %v221_v17  ;;  %v232_v24 = vld [vmem:[%s943_s2 + $0x18] sm:$0xff]  ;;  %v499_v25 = vpack.c.bf16 %v228_v20, %v226_v19  ;;  %p612_p8 = scmp.ne.s32.totalorder %s887_s8, %s611_s28  ;;  %s700_s29 = smov [#allocation5]  }
  0x40   : > { %245 = vperm.xlu1 %580, %v231_v21   ;;  %v225_v26 = vld [vmem:[%s839_s21 + $0x60] sm:$0xff]  ;;  %v227_v27 = vld [vmem:[%s839_s21 + $0x70] sm:$0xff]  ;;  %235 = vperm.xlu0 %579, %v229_v22   ;;  %v230_v28 = vld [vmem:[%s943_s2 + $0x8] sm:$0xff]  ;;  %s615_s30 = sshll.u32 %s700_s29, 4  ;;  %s616_s30 = int_to_ptr.vmem [resolvable:$false] %s615_s30 }
  0x41   : > { %v501_v29 = vpack.c.bf16 %v227_v27, %v225_v26  ;;  %v209_v30 = vld [vmem:[%s942_s1] sm:$0xff]  ;;  %v211_v31 = vld [vmem:[%s942_s1 + $0x10] sm:$0xff]  ;;  %v210_v32 = vld [vmem:[%s942_s1 + $0x8] sm:$0xff]  ;;  %p613_p11 = pnand %p612_p8, %p952_p9  ;;  %s617_s4 = scalar_lea.vmem %s616_s30, 2048 }
  0x42   : > { %494 = vmatpush1.bf16.msra.mxu0 %v493_v15  ;;  %508 = vmatpush1.bf16.msra.mxu1 %v493_v15  ;;  %v212_v33 = vld [vmem:[%s942_s1 + $0x18] sm:$0xff]  ;;  %p618_p6 = scmp.lt.s32.totalorder %s887_s8, %s616_s30  ;;  %p619_p13 = scmp.lt.s32.totalorder %s617_s4, %s611_s28 }
  0x43   : > { %496 = vmatprep.subr.bf16.mxu0 %v495_v16  ;;  %505 = vmatprep.subr.bf16.mxu1 %v495_v16  ;;  %p614_p0 = pneg %p613_p11 }
  0x44   : > { %250 = vperm.xlu1 %580, %v232_v24   ;;  %240 = vperm.xlu0 %579, %v230_v28   ;;  %p620_p2 = por %p619_p13, %p618_p6 }
  0x46   : > { %498 = vmatpush1.bf16.msra.mxu0 %v497_v23  ;;  %509 = vmatpush1.bf16.msra.mxu1 %v497_v23  ;;  %p621_p5 = pnand %p620_p2, %p614_p0 }
  0x47   : > { %500 = vmatprep.subr.bf16.mxu0 %v499_v25  ;;  %506 = vmatprep.subr.bf16.mxu1 %v499_v25 }
  0x4a   : > { %502 = vmatpush1.bf16.msra.mxu0 %v501_v29  ;;  %510 = vmatpush1.bf16.msra.mxu1 %v501_v29 }
  0x4d   : > { %476 = vmatmul.mubr.msk.f32.vlgmr.msra.gmra.mrb[0].mxu0 %vm253_vm0, %v209_v30  ;;  %478 = vmatmul.mubr.msk.f32.vlgmr.msra.gmra.mrb[0].mxu1 %vm253_vm0, %v211_v31 }
  0x4e   : > { %336 = vmatprep.mubr.f32.mxu0 %v698_v0  ;;  %348 = vmatprep.mubr.f32.mxu1 %v698_v0 }
  0x51   : > { %477 = vmatmul.mubr.msk.f32.gmra.mrb[2].mxu0 %vm253_vm0, %v210_v32  ;;  %479 = vmatmul.mubr.msk.f32.gmra.mrb[2].mxu1 %vm253_vm0, %v212_v33 }
  0xbf   : > { %v246_v34 = vpop.permute.xlu1 %245  ;;  %v236_v35 = vpop.permute.xlu0 %235 }
  0xc3   : > { %v251_v44 = vpop.permute.xlu1 %250  ;;  %v241_v45 = vpop.permute.xlu0 %240 }
 0x120   : > { %v332_v36 = vpop.f32.mrb[0].mxu0  ;;  %v344_v37 = vpop.f32.mrb[0].mxu1 }
 0x121   : > { %v333_v38 = vadd.f32 %v332_v36, %v236_v35  ;;  %v345_v39 = vadd.f32 %v344_v37, %v246_v34  ;;  %v334_v40 = vpop.f32.mrb[1].mxu0  ;;  %v346_v41 = vpop.f32.mrb[1].mxu1 }
 0x122   : > { %v335_v42 = vadd.f32 %v334_v40, %v236_v35  ;;  %v347_v43 = vadd.f32 %v346_v41, %v246_v34 }
 0x123   : > { %355 = vst [vmem:[%s206_s6] sm:$0xff] %v333_v38  ;;  %359 = vst [vmem:[%s206_s6 + $0x20] sm:$0xff] %v345_v39 }
 0x124   : > { %356 = vst [vmem:[%s206_s6 + $0x8] sm:$0xff] %v335_v42  ;;  %360 = vst [vmem:[%s206_s6 + $0x28] sm:$0xff] %v347_v43  ;;  %v338_v46 = vpop.f32.mrb[2].mxu0  ;;  %v350_v47 = vpop.f32.mrb[2].mxu1 }
 0x125   : > { %v339_v48 = vadd.f32 %v338_v46, %v241_v45  ;;  %v351_v49 = vadd.f32 %v350_v47, %v251_v44  ;;  %v340_v50 = vpop.f32.mrb[3].mxu0  ;;  %v352_v51 = vpop.f32.mrb[3].mxu1 }
 0x126   : > { %v341_v52 = vadd.f32 %v340_v50, %v241_v45  ;;  %v353_v53 = vadd.f32 %v352_v51, %v251_v44 }
 0x127   : > { %357 = vst [vmem:[%s206_s6 + $0x10] sm:$0xff] %v339_v48  ;;  %361 = vst [vmem:[%s206_s6 + $0x30] sm:$0xff] %v351_v49 }
 0x128   : > { %358 = vst [vmem:[%s206_s6 + $0x18] sm:$0xff] %v341_v52  ;;  %362 = vst [vmem:[%s206_s6 + $0x38] sm:$0xff] %v353_v53 }
 0x129   : > { %624 = shalt.err (!%p621_p5)
}
 0x12a   : > { %s625_s5 = scalar_lea.hbm %s892_s22, 1024  ;;  %s629_s19 = scalar_lea.hbm %s944_s3, 2048 }
 0x12b   : > { %p626_p4 = scmp.ne.s32.totalorder %s892_s22, %s625_s5  ;;  %p630_p12 = scmp.lt.u32.totalorder %s892_s22, %s944_s3 }
 0x12c   : > { %p631_p1 = scmp.lt.u32.totalorder %s629_s19, %s625_s5  ;;  %p633_p8 = scmp.lt.u32.totalorder %s625_s5, %s892_s22 }
 0x12d   : > { %p627_p7 = pnand %p626_p4, %p952_p9 }
 0x12e   : > { %p632_p3 = por %p631_p1, %p630_p12 }
 0x12f   : > { %p628_p10 = pneg %p627_p7 }
 0x130   : > { %p634_p11 = por %p633_p8, %p632_p3 }
 0x132   : > { %p635_p0 = pnand %p634_p11, %p628_p10 }
 0x134   : > { %638 = shalt.err (!%p635_p0)
}
 0x135   : > { %s701_s6 = smov 256   ;;  %s702_s9 = smov 16  }
 0x136   : > { %513 = dma.vmem_to_hbm [thread:$0]  (%p952_p9), %s887_s8, 1024, %s892_s22, %s364_s23, %s701_s6, %s701_s6, %s702_s9  }
 0x137 PF: > { %s394_s10 = sand.u32 1, %s673_s12   ;;  %p953_p6 = scmp.ne.s32.totalorder %s949_s27, 0 }
 0x138   : > { %p954_p13 = scmp.ge.s32.totalorder %s693_s17, 2  ;;  %s395_s15 = scalar_lea.sflag [#allocation4], %s394_s10 }
 0x13a   : > { %p520_p2 = pnand %p954_p13, %p953_p6 }
 0x13c   : > { %668 = dma.done.wait (!%p520_p2), %s395_s15, 1024  }
 0x13d   : > { %670 = vsyncadd (!%p520_p2), %s395_s15, 4294966272  ;;  %s19_s17 = sadd.s32 1, %s693_s17   ;;  %s955_s12 = smov %s677_s13 }
 0x13e   : > { %p16_p5 = scmp.ge.s32.totalorder %s19_s17, 4   ;;  %s956_s13 = smov %s681_s14 }
 0x13f   : > { %s957_s14 = smov %s779_s26  ;;  %s958_s15 = smov %s689_s16 }
 0x140   : > { %s959_s16 = smov %s961_s20  ;;  %18 = sbr.rel (!%p16_p5) target bundleno = 6 (0x6), region = 77 }
 0x147   :  { %400 = vsyncpa [#allocation3], 1 }
 0x148   :  { %402 = vsyncpa [#allocation3 + $0x1], 1 }
 0x149   :  { %403 = vsyncpa [#allocation4], 1 }
 0x14a   :  { %405 = vsyncpa [#allocation4 + $0x1], 1 }

</bundles_post_ra>
